<compile_context>
chip_gen: v7x
topology: tpu7x:2x2x1
jax: 0.10.0
libtpu: 0.0.40
codegen_flags: <defaults>
</compile_context>

<pallas_src>
import functools

import jax
import jax.numpy as jnp
from jax.experimental import pallas as pl
from jax.experimental.pallas import tpu as pltpu

# Reciprocals of the piecewise-linear segment widths (15-4, 30-15, 50-30).
_INV11 = 1.0 / 11.0
_INV15 = 1.0 / 15.0
_INV20 = 1.0 / 20.0


def _dseir_kernel(x_ref, p_ref, o_ref, *, sigma):
    # All inputs live in SMEM; every read below is a 32-bit scalar load.
    S0 = x_ref[0]
    E0 = x_ref[1]
    I0 = x_ref[2]
    R0 = x_ref[3]
    S1 = x_ref[4]
    E1 = x_ref[5]
    I1 = x_ref[6]
    R1 = x_ref[7]
    t = x_ref[8]

    b0, b1, b2, b3 = p_ref[0], p_ref[1], p_ref[2], p_ref[3]
    g0, g1, g2, g3 = p_ref[4], p_ref[5], p_ref[6], p_ref[7]

    N = S0 + E0 + I0 + R0
    inv_n = 1.0 / N  # single divide, reused three times

    def piecewise(tt, le4, le15, le30, a, b, c, d):
        # Branchless computeBeta / computeGamma with shared predicates and
        # constant-reciprocal multiplies instead of divides.
        v_le4 = a
        v_le15 = a + (b - a) * ((tt - 4.0) * _INV11)
        v_le30 = b + (c - b) * ((tt - 15.0) * _INV15)
        v_gt30 = c + (d - c) * ((tt - 30.0) * _INV20)
        v = jnp.where(le4, v_le4,
                      jnp.where(le15, v_le15,
                                jnp.where(le30, v_le30, v_gt30)))
        return jnp.maximum(0.0, v)

    # Predicates for t (used once) and for t + 1 (shared by beta & gamma).
    le4_t, le15_t, le30_t = t <= 4.0, t <= 15.0, t <= 30.0
    t1 = t + 1.0
    le4_t1, le15_t1, le30_t1 = t1 <= 4.0, t1 <= 15.0, t1 <= 30.0

    beta_t = piecewise(t, le4_t, le15_t, le30_t, b0, b1, b2, b3)
    beta_t1 = piecewise(t1, le4_t1, le15_t1, le30_t1, b0, b1, b2, b3)
    gamma_t1 = piecewise(t1, le4_t1, le15_t1, le30_t1, g0, g1, g2, g3)

    one_m_sigma = 1.0 - sigma
    preE_1 = one_m_sigma * E0 + beta_t * I0 * S0 * inv_n
    preS = (1.0 - beta_t1 * I1 * inv_n) * S1
    preE = one_m_sigma * E1 + beta_t1 * I1 * S1 * inv_n
    preI = (1.0 - gamma_t1) * I1 + sigma * preE_1
    preR = R1 + gamma_t1 * I1

    # Single contiguous SMEM output: [preS, preE, preI, preR].
    o_ref[0] = preS
    o_ref[1] = preE
    o_ref[2] = preI
    o_ref[3] = preR


def dseir_forward(x, params, sigma):
    """x: (9,) f32, params: (8,) f32 -> (4,) f32 = [preS, preE, preI, preR]."""
    x = x.astype(jnp.float32)
    params = params.astype(jnp.float32)

    out = pl.pallas_call(
        functools.partial(_dseir_kernel, sigma=float(sigma)),
        out_shape=jax.ShapeDtypeStruct((4,), jnp.float32),
        in_specs=[
            pl.BlockSpec(memory_space=pltpu.MemorySpace.SMEM),
            pl.BlockSpec(memory_space=pltpu.MemorySpace.SMEM),
        ],
        out_specs=pl.BlockSpec(memory_space=pltpu.MemorySpace.SMEM),
    )(x, params)
    return out


def dseir_reference(x, params, sigma):
    """Pure-JAX reference mirroring the PyTorch forward exactly."""
    S0, E0, I0, R0, S1, E1, I1, R1, t = [x[i] for i in range(9)]
    N = S0 + E0 + I0 + R0

    def piecewise(tt, a, b, c, d):
        v = jnp.where(tt <= 4.0, a,
                      jnp.where(tt <= 15.0, a + (b - a) * (tt - 4.0) / 11.0,
                                jnp.where(tt <= 30.0,
                                          b + (c - b) * (tt - 15.0) / 15.0,
                                          c + (d - c) * (tt - 30.0) / 20.0)))
        return jnp.maximum(0.0, v)

    beta_t = piecewise(t, params[0], params[1], params[2], params[3])
    beta_t1 = piecewise(t + 1.0, params[0], params[1], params[2], params[3])
    gamma_t1 = piecewise(t + 1.0, params[4], params[5], params[6], params[7])

    preE_1 = (1.0 - sigma) * E0 + beta_t * I0 * S0 / N
    preS = (1.0 - beta_t1 * I1 / N) * S1
    preE = (1.0 - sigma) * E1 + beta_t1 * I1 * S1 / N
    preI = (1.0 - gamma_t1) * I1 + sigma * preE_1
    preR = R1 + gamma_t1 * I1
    return preS, preE, preI, preR


if __name__ == "__main__":
    sigma = 0.25  # module hyperparameter chosen deterministically

    # Parameters exactly as in the PyTorch __init__.
    params = jnp.array([0.07, 0.05, 0.02, 0.005, 0.0001, 0.001, 0.02, 0.05],
                       dtype=jnp.float32)

    # Deterministic input X = [S_0,E_0,I_0,R_0,S_1,E_1,I_1,R_1,t].
    key = jax.random.PRNGKey(0)
    pops = jax.random.uniform(key, (8,), dtype=jnp.float32,
                              minval=1.0, maxval=100.0)
    t = jnp.array([10.0], dtype=jnp.float32)  # lands in the 4 < t <= 15 branch
    x = jnp.concatenate([pops, t])

    out = dseir_forward(x, params, sigma)
    out = jax.block_until_ready(out)

    ref = dseir_reference(x, params, sigma)  # (preS, preE, preI, preR)
    for o, r in zip(out, ref):
        assert jnp.allclose(o, r, rtol=1e-5, atol=1e-6), (o, r)

    print("KERNEL_OK")
</pallas_src>

<mosaic_0001>
module attributes {stable_mosaic.version = 11 : i64} {
  func.func @_dseir_kernel(%arg0: memref<9xf32, #tpu.memory_space<smem>>, %arg1: memref<8xf32, #tpu.memory_space<smem>>, %arg2: memref<4xf32, #tpu.memory_space<smem>>) attributes {dimension_semantics = [], scalar_prefetch = 0 : i64, scratch_operands = 0 : i64, tpu.core_type = #tpu.core_type<tc>} {
    %c0 = arith.constant 0 : index
    %0 = memref.load %arg0[%c0] : memref<9xf32, #tpu.memory_space<smem>>
    %c1 = arith.constant 1 : index
    %1 = memref.load %arg0[%c1] : memref<9xf32, #tpu.memory_space<smem>>
    %c2 = arith.constant 2 : index
    %2 = memref.load %arg0[%c2] : memref<9xf32, #tpu.memory_space<smem>>
    %c3 = arith.constant 3 : index
    %3 = memref.load %arg0[%c3] : memref<9xf32, #tpu.memory_space<smem>>
    %c4 = arith.constant 4 : index
    %4 = memref.load %arg0[%c4] : memref<9xf32, #tpu.memory_space<smem>>
    %c5 = arith.constant 5 : index
    %5 = memref.load %arg0[%c5] : memref<9xf32, #tpu.memory_space<smem>>
    %c6 = arith.constant 6 : index
    %6 = memref.load %arg0[%c6] : memref<9xf32, #tpu.memory_space<smem>>
    %c7 = arith.constant 7 : index
    %7 = memref.load %arg0[%c7] : memref<9xf32, #tpu.memory_space<smem>>
    %c8 = arith.constant 8 : index
    %8 = memref.load %arg0[%c8] : memref<9xf32, #tpu.memory_space<smem>>
    %c0_0 = arith.constant 0 : index
    %9 = memref.load %arg1[%c0_0] : memref<8xf32, #tpu.memory_space<smem>>
    %c1_1 = arith.constant 1 : index
    %10 = memref.load %arg1[%c1_1] : memref<8xf32, #tpu.memory_space<smem>>
    %c2_2 = arith.constant 2 : index
    %11 = memref.load %arg1[%c2_2] : memref<8xf32, #tpu.memory_space<smem>>
    %c3_3 = arith.constant 3 : index
    %12 = memref.load %arg1[%c3_3] : memref<8xf32, #tpu.memory_space<smem>>
    %c4_4 = arith.constant 4 : index
    %13 = memref.load %arg1[%c4_4] : memref<8xf32, #tpu.memory_space<smem>>
    %c5_5 = arith.constant 5 : index
    %14 = memref.load %arg1[%c5_5] : memref<8xf32, #tpu.memory_space<smem>>
    %c6_6 = arith.constant 6 : index
    %15 = memref.load %arg1[%c6_6] : memref<8xf32, #tpu.memory_space<smem>>
    %c7_7 = arith.constant 7 : index
    %16 = memref.load %arg1[%c7_7] : memref<8xf32, #tpu.memory_space<smem>>
    %17 = arith.addf %0, %1 : f32
    %18 = arith.addf %17, %2 : f32
    %19 = arith.addf %18, %3 : f32
    %cst = arith.constant 1.000000e+00 : f32
    %20 = arith.divf %cst, %19 : f32
    %cst_8 = arith.constant 4.000000e+00 : f32
    %21 = arith.cmpf ole, %8, %cst_8 : f32
    %cst_9 = arith.constant 1.500000e+01 : f32
    %22 = arith.cmpf ole, %8, %cst_9 : f32
    %cst_10 = arith.constant 3.000000e+01 : f32
    %23 = arith.cmpf ole, %8, %cst_10 : f32
    %cst_11 = arith.constant 1.000000e+00 : f32
    %24 = arith.addf %8, %cst_11 : f32
    %cst_12 = arith.constant 4.000000e+00 : f32
    %25 = arith.cmpf ole, %24, %cst_12 : f32
    %cst_13 = arith.constant 1.500000e+01 : f32
    %26 = arith.cmpf ole, %24, %cst_13 : f32
    %cst_14 = arith.constant 3.000000e+01 : f32
    %27 = arith.cmpf ole, %24, %cst_14 : f32
    %28 = arith.subf %10, %9 : f32
    %cst_15 = arith.constant 4.000000e+00 : f32
    %29 = arith.subf %8, %cst_15 : f32
    %cst_16 = arith.constant 0.0909090936 : f32
    %30 = arith.mulf %29, %cst_16 : f32
    %31 = arith.mulf %28, %30 : f32
    %32 = arith.addf %9, %31 : f32
    %33 = arith.subf %11, %10 : f32
    %cst_17 = arith.constant 1.500000e+01 : f32
    %34 = arith.subf %8, %cst_17 : f32
    %cst_18 = arith.constant 0.0666666701 : f32
    %35 = arith.mulf %34, %cst_18 : f32
    %36 = arith.mulf %33, %35 : f32
    %37 = arith.addf %10, %36 : f32
    %38 = arith.subf %12, %11 : f32
    %cst_19 = arith.constant 3.000000e+01 : f32
    %39 = arith.subf %8, %cst_19 : f32
    %cst_20 = arith.constant 5.000000e-02 : f32
    %40 = arith.mulf %39, %cst_20 : f32
    %41 = arith.mulf %38, %40 : f32
    %42 = arith.addf %11, %41 : f32
    %43 = arith.select %23, %37, %42 : f32
    %44 = arith.select %22, %32, %43 : f32
    %45 = arith.select %21, %9, %44 : f32
    %cst_21 = arith.constant 0.000000e+00 : f32
    %46 = arith.maximumf %cst_21, %45 : f32
    %47 = arith.subf %10, %9 : f32
    %cst_22 = arith.constant 4.000000e+00 : f32
    %48 = arith.subf %24, %cst_22 : f32
    %cst_23 = arith.constant 0.0909090936 : f32
    %49 = arith.mulf %48, %cst_23 : f32
    %50 = arith.mulf %47, %49 : f32
    %51 = arith.addf %9, %50 : f32
    %52 = arith.subf %11, %10 : f32
    %cst_24 = arith.constant 1.500000e+01 : f32
    %53 = arith.subf %24, %cst_24 : f32
    %cst_25 = arith.constant 0.0666666701 : f32
    %54 = arith.mulf %53, %cst_25 : f32
    %55 = arith.mulf %52, %54 : f32
    %56 = arith.addf %10, %55 : f32
    %57 = arith.subf %12, %11 : f32
    %cst_26 = arith.constant 3.000000e+01 : f32
    %58 = arith.subf %24, %cst_26 : f32
    %cst_27 = arith.constant 5.000000e-02 : f32
    %59 = arith.mulf %58, %cst_27 : f32
    %60 = arith.mulf %57, %59 : f32
    %61 = arith.addf %11, %60 : f32
    %62 = arith.select %27, %56, %61 : f32
    %63 = arith.select %26, %51, %62 : f32
    %64 = arith.select %25, %9, %63 : f32
    %cst_28 = arith.constant 0.000000e+00 : f32
    %65 = arith.maximumf %cst_28, %64 : f32
    %66 = arith.subf %14, %13 : f32
    %cst_29 = arith.constant 4.000000e+00 : f32
    %67 = arith.subf %24, %cst_29 : f32
    %cst_30 = arith.constant 0.0909090936 : f32
    %68 = arith.mulf %67, %cst_30 : f32
    %69 = arith.mulf %66, %68 : f32
    %70 = arith.addf %13, %69 : f32
    %71 = arith.subf %15, %14 : f32
    %cst_31 = arith.constant 1.500000e+01 : f32
    %72 = arith.subf %24, %cst_31 : f32
    %cst_32 = arith.constant 0.0666666701 : f32
    %73 = arith.mulf %72, %cst_32 : f32
    %74 = arith.mulf %71, %73 : f32
    %75 = arith.addf %14, %74 : f32
    %76 = arith.subf %16, %15 : f32
    %cst_33 = arith.constant 3.000000e+01 : f32
    %77 = arith.subf %24, %cst_33 : f32
    %cst_34 = arith.constant 5.000000e-02 : f32
    %78 = arith.mulf %77, %cst_34 : f32
    %79 = arith.mulf %76, %78 : f32
    %80 = arith.addf %15, %79 : f32
    %81 = arith.select %27, %75, %80 : f32
    %82 = arith.select %26, %70, %81 : f32
    %83 = arith.select %25, %13, %82 : f32
    %cst_35 = arith.constant 0.000000e+00 : f32
    %84 = arith.maximumf %cst_35, %83 : f32
    %cst_36 = arith.constant 7.500000e-01 : f32
    %85 = arith.mulf %cst_36, %1 : f32
    %86 = arith.mulf %46, %2 : f32
    %87 = arith.mulf %86, %0 : f32
    %88 = arith.mulf %87, %20 : f32
    %89 = arith.addf %85, %88 : f32
    %90 = arith.mulf %65, %6 : f32
    %91 = arith.mulf %90, %20 : f32
    %cst_37 = arith.constant 1.000000e+00 : f32
    %92 = arith.subf %cst_37, %91 : f32
    %93 = arith.mulf %92, %4 : f32
    %cst_38 = arith.constant 7.500000e-01 : f32
    %94 = arith.mulf %cst_38, %5 : f32
    %95 = arith.mulf %65, %6 : f32
    %96 = arith.mulf %95, %4 : f32
    %97 = arith.mulf %96, %20 : f32
    %98 = arith.addf %94, %97 : f32
    %cst_39 = arith.constant 1.000000e+00 : f32
    %99 = arith.subf %cst_39, %84 : f32
    %100 = arith.mulf %99, %6 : f32
    %cst_40 = arith.constant 2.500000e-01 : f32
    %101 = arith.mulf %cst_40, %89 : f32
    %102 = arith.addf %100, %101 : f32
    %103 = arith.mulf %84, %6 : f32
    %104 = arith.addf %7, %103 : f32
    %c0_41 = arith.constant 0 : index
    %105 = memref.load %arg2[%c0_41] : memref<4xf32, #tpu.memory_space<smem>>
    memref.store %93, %arg2[%c0_41] : memref<4xf32, #tpu.memory_space<smem>>
    %c1_42 = arith.constant 1 : index
    %106 = memref.load %arg2[%c1_42] : memref<4xf32, #tpu.memory_space<smem>>
    memref.store %98, %arg2[%c1_42] : memref<4xf32, #tpu.memory_space<smem>>
    %c2_43 = arith.constant 2 : index
    %107 = memref.load %arg2[%c2_43] : memref<4xf32, #tpu.memory_space<smem>>
    memref.store %102, %arg2[%c2_43] : memref<4xf32, #tpu.memory_space<smem>>
    %c3_44 = arith.constant 3 : index
    %108 = memref.load %arg2[%c3_44] : memref<4xf32, #tpu.memory_space<smem>>
    memref.store %104, %arg2[%c3_44] : memref<4xf32, #tpu.memory_space<smem>>
    return
  }
}

</mosaic_0001>

<bundles_post_ra>
// kernel: tpu_custom_call.1
= control target key start
LH: loop header
LB: loop body
LE: loop exit
PB: predicated region body
PF: predicated region fallthrough
CT: control target
= control target key end

     0   :  { %7 = vsyncpa [#allocation3], 0  ;;  %s372_s0 = inlined_call_operand.hbm [shape: f32[9], index: 0, kind: input, shape index: {}]   ;;  %s373_s1 = inlined_call_operand.vmem [shape: f32[8], index: 1, kind: input, shape index: {}]   ;;  %s374_s2 = inlined_call_operand.hbm [shape: f32[4], index: 2, kind: output, shape index: {}]  }
   0x1   :  { %8 = vsyncpa [#allocation5], 0 }
   0x2   :  { %9 = vsyncpa [#allocation4], 0  ;;  %s24_s11 = sshll.u32 %s373_s1, 4  ;;  %s184_s14 = scalar_lea.hbm %s372_s0, 16  ;;  %s25_s11 = int_to_ptr.vmem [resolvable:$true] %s24_s11 }
   0x3   :  { %p185_p0 = scmp.ne.s32.totalorder %s372_s0, %s184_s14  ;;  %p188_p1 = scmp.lt.u32.totalorder %s184_s14, %s372_s0 }
   0x5   :  { %p190_p2 = pnand %p188_p1, %p185_p0 }
   0x7   :  { %193 = shalt.err (!%p190_p2)
}
   0x8   :  { %s222_s19 = smov [#allocation2]   ;;  %s194_s1 = scalar_lea.vmem %s25_s11, 16 }
   0x9   :  { %17 = dma.hbm_to_smem %s372_s0, 16, %s222_s19, [#allocation3]  }
   0xa   :  { %p195_p3 = scmp.ne.s32.totalorder %s25_s11, %s194_s1  ;;  %p199_p4 = scmp.lt.s32.totalorder %s25_s11, %s25_s11 }
   0xb   :  { %p200_p5 = scmp.lt.s32.totalorder %s194_s1, %s194_s1 }
   0xd   :  { %p201_p6 = por %p200_p5, %p199_p4 }
   0xf   :  { %p202_p7 = pnand %p201_p6, %p195_p3 }
  0x11   :  { %205 = shalt.err (!%p202_p7)
}
  0x12   :  { %s223_s22 = smov [#allocation6]  }
  0x13   :  { %27 = dma.vmem_to_smem %s25_s11, 16, %s223_s22, [#allocation5]  }
  0x14   :  { %216 = dma.done.wait [#allocation3], 16  }
  0x15   :  { %217 = vsyncadd [#allocation3], 4294967280 }
  0x16   :  { %218 = dma.done.wait [#allocation5], 16  }
  0x17   :  { %219 = vsyncadd [#allocation5], 4294967280 }
  0x18   :  { %34 = sfence }
  0x19   :  { %s256_s23 = sld [smem:[#allocation2]]  ;;  %s258_s24 = sld [smem:[#allocation2 + $0x1]] }
  0x1a   :  { %s260_s0 = sld [smem:[#allocation2 + $0x2]]  ;;  %s157_s25 = sld [smem:[#allocation2 + $0x3]] }
  0x1b   :  { %s262_s26 = sld [smem:[#allocation6]]  ;;  %s266_s28 = sld [smem:[#allocation6 + $0x1]] }
  0x1c   :  { %s268_s29 = sld [smem:[#allocation6 + $0x2]]  ;;  %s271_s3 = sld [smem:[#allocation2 + $0x8]] }
  0x1d   :  { %s165_s4 = sld [smem:[#allocation6 + $0x3]]  ;;  %s278_s8 = sld [smem:[#allocation6 + $0x4]] }
  0x1e   :  { %s285_s12 = sld [smem:[#allocation6 + $0x5]]  ;;  %s292_s16 = sld [smem:[#allocation6 + $0x6]] }
  0x1f   :  { %s52_s27 = sadd.f32 %s258_s24, %s256_s23  ;;  %s169_s22 = sld [smem:[#allocation6 + $0x7]] }
  0x21   :  { %s53_s30 = sadd.f32 %s260_s0, %s52_s27 }
  0x22   :  { %s275_s6 = ssub.f32 %s266_s28, %s262_s26  ;;  %p60_p8 = scmp.le.f32.partialorder %s271_s3, 30.0 }
  0x23   :  { %s54_s5 = sadd.f32 %s157_s25, %s53_s30  ;;  %p59_p9 = scmp.le.f32.partialorder %s271_s3, 15.0 }
  0x24   :  { %s170_s7 = sadd.f32 -4.0, %s271_s3  ;;  %p58_p10 = scmp.le.f32.partialorder %s271_s3, 4.0 }
  0x25   :  { %v55_v0 = vstv %s54_s5  ;;  %s282_s9 = ssub.f32 %s268_s29, %s266_s28 }
  0x26   :  { %182 = vrcp.f32 %v55_v0  ;;  %s67_s10 = smul.f32 0.09090909, %s170_s7  ;;  %s171_s11 = sadd.f32 -15.0, %s271_s3 }
  0x27   :  { %s288_s13 = ssub.f32 %s165_s4, %s268_s29 }
  0x28   :  { %s68_s14 = smul.f32 %s67_s10, %s275_s6  ;;  %s172_s15 = sadd.f32 -30.0, %s271_s3 }
  0x29   :  { %s72_s17 = smul.f32 0.06666667, %s171_s11  ;;  %s296_s19 = sadd.f32 1.0, %s271_s3 }
  0x2a   :  { %s77_s18 = smul.f32 0.05, %s172_s15  ;;  %s69_s21 = sadd.f32 %s68_s14, %s262_s26 }
  0x2b   :  { %s73_s20 = smul.f32 %s72_s17, %s282_s9  ;;  %s173_s30 = sadd.f32 -4.0, %s296_s19 }
  0x2c   :  { %s78_s1 = smul.f32 %s77_s18, %s288_s13  ;;  %s174_s4 = sadd.f32 -15.0, %s296_s19 }
  0x2d   :  { %s74_s25 = sadd.f32 %s266_s28, %s73_s20  ;;  %s311_s10 = smul.f32 0.09090909, %s173_s30 }
  0x2e   :  { %s79_s27 = sadd.f32 %s268_s29, %s78_s1  ;;  %s224_s14 = smov 0.0  }
  0x2f   :  { %s175_s5 = sadd.f32 -30.0, %s296_s19  ;;  %s89_s3 = smul.f32 0.06666667, %s174_s4 }
  0x30   :  { %v183_v1 = vpop.eup %182  ;;  %s376_s25 = smov (!%p60_p8, %s74_s25), %s79_s27  ;;  %s103_s11 = ssub.f32 %s292_s16, %s285_s12 }
  0x31   :  { %176 = vpush %v183_v1  ;;  %s378_s21 = smov (!%p59_p9, %s69_s21), %s376_s25  ;;  %s93_s17 = smul.f32 0.05, %s175_s5 }
  0x32   :  { %s82_s7 = scalar_select %p58_p10, %s262_s26, %s378_s21 }
  0x33   :  { %s100_s18 = ssub.f32 %s285_s12, %s278_s8  ;;  %s104_s1 = smul.f32 %s103_s11, %s89_s3 }
  0x34   :  { %s83_s15 = smax.f32 %s224_s14, %s82_s7  ;;  %s106_s20 = ssub.f32 %s169_s22, %s292_s16 }
  0x35   :  { %s114_s21 = smul.f32 %s260_s0, %s83_s15  ;;  %s324_s4 = sld [smem:[#allocation2 + $0x6]] }
  0x36   :  { %s107_s25 = smul.f32 %s106_s20, %s93_s17  ;;  %s105_s5 = sadd.f32 %s285_s12, %s104_s1 }
  0x37   :  { %s101_s27 = smul.f32 %s100_s18, %s311_s10  ;;  %p62_p11 = scmp.le.f32.partialorder %s296_s19, 4.0 }
  0x38   :  { %s322_s30 = smul.f32 %s114_s21, %s256_s23  ;;  %s108_s22 = sadd.f32 %s292_s16, %s107_s25 }
  0x39   :  { %p64_p12 = scmp.le.f32.partialorder %s296_s19, 30.0  ;;  %s102_s0 = sadd.f32 %s278_s8, %s101_s27 }
  0x3a   :  { %p63_p13 = scmp.le.f32.partialorder %s296_s19, 15.0  ;;  %s90_s7 = smul.f32 %s89_s3, %s282_s9 }
  0x3b   :  { %s380_s5 = smov (!%p64_p12, %s105_s5), %s108_s22  ;;  %s94_s23 = smul.f32 %s93_s17, %s288_s13 }
  0x3c   :  { %s161_s11 = sld [smem:[#allocation2 + $0x7]]  ;;  %s382_s0 = smov (!%p63_p13, %s102_s0), %s380_s5 }
  0x3d   :  { %s86_s12 = smul.f32 %s311_s10, %s275_s6  ;;  %s384_s8 = smov (!%p62_p11, %s278_s8), %s382_s0 }
  0x3e   :  { %s91_s16 = sadd.f32 %s266_s28, %s90_s7  ;;  %s112_s18 = smax.f32 %s224_s14, %s384_s8 }
  0x3f   :  { %s95_s15 = sadd.f32 %s268_s29, %s94_s23  ;;  %s130_s20 = smul.f32 %s324_s4, %s112_s18 }
  0x40   :  { %s87_s9 = sadd.f32 %s86_s12, %s262_s26  ;;  %s159_s6 = sld [smem:[#allocation2 + $0x5]] }
  0x41   :  { %s386_s16 = smov (!%p64_p12, %s91_s16), %s95_s15  ;;  %s158_s13 = sld [smem:[#allocation2 + $0x4]] }
  0x42   :  { %s131_s3 = sadd.f32 %s161_s11, %s130_s20  ;;  %s388_s9 = smov (!%p63_p13, %s87_s9), %s386_s16 }
  0x43   :  { %s390_s26 = smov (!%p62_p11, %s262_s26), %s388_s9  ;;  %s113_s29 = smul.f32 0.75, %s258_s24 }
  0x44   :  { %139 = sst [smem:[#allocation7 + $0x3]] %s131_s3  ;;  %s99_s10 = smax.f32 %s224_s14, %s390_s26 }
  0x45   :  { %s118_s28 = smul.f32 %s324_s4, %s99_s10  ;;  %s126_s1 = ssub.f32 1.0, %s112_s18 }
  0x46   :  { %s122_s17 = smul.f32 0.75, %s159_s6  ;;  %s206_s24 = scalar_lea.hbm %s374_s2, 16 }
  0x47   :  { %s123_s8 = smul.f32 %s158_s13, %s118_s28  ;;  %p207_p0 = scmp.ne.s32.totalorder %s374_s2, %s206_s24 }
  0x48   :  { %s127_s7 = smul.f32 %s324_s4, %s126_s1  ;;  %p210_p1 = scmp.lt.u32.totalorder %s206_s24, %s374_s2 }
  0x4a   :  { %p212_p2 = pnand %p210_p1, %p207_p0 }
  0x62   :  { %s177_s21 = spop %176 }
  0x63   :  { %s116_s25 = smul.f32 %s177_s21, %s322_s30 }
  0x64   :  { %s119_s27 = smul.f32 %s177_s21, %s118_s28 }
  0x65   :  { %s117_s5 = sadd.f32 %s116_s25, %s113_s29  ;;  %s124_s22 = smul.f32 %s177_s21, %s123_s8 }
  0x66   :  { %s120_s0 = ssub.f32 1.0, %s119_s27 }
  0x67   :  { %s125_s23 = sadd.f32 %s124_s22, %s122_s17  ;;  %s128_s19 = smul.f32 0.25, %s117_s5 }
  0x68   :  { %s121_s11 = smul.f32 %s158_s13, %s120_s0 }
  0x69   :  { %135 = sst [smem:[#allocation7 + $0x1]] %s125_s23 }
  0x6a   :  { %133 = sst [smem:[#allocation7]] %s121_s11 }
  0x6b   :  { %s129_s12 = sadd.f32 %s128_s19, %s127_s7 }
  0x6d   :  { %137 = sst [smem:[#allocation7 + $0x2]] %s129_s12 }
  0x6e   :  { %215 = shalt.err (!%p212_p2)
}
  0x6f   :  { %s225_s4 = smov [#allocation7]  }
  0x70   :  { %147 = dma.smem_to_hbm %s225_s4, 16, %s374_s2, [#allocation4]  }
  0x71   :  { %220 = dma.done.wait [#allocation4], 16  }
  0x72   :  { %221 = vsyncadd [#allocation4], 4294967280 }
  0x73   :  { %151 = sfence }
  0x74   :  { %152 = vsyncpa [#allocation3], 1 }
  0x75   :  { %153 = vsyncpa [#allocation4], 1 }
  0x76   :  { %154 = vsyncpa [#allocation5], 1 }

</bundles_post_ra>
